<compile_context>
chip_gen: v7x
topology: tpu7x:2x2x1
jax: 0.10.0
libtpu: 0.0.40
codegen_flags: <defaults>
</compile_context>

<pallas_src>
import math

import jax
import jax.numpy as jnp
from jax.experimental import pallas as pl
from jax.experimental.pallas import tpu as pltpu


def _round_up(n, m):
    return ((n + m - 1) // m) * m


def _cdiv(a, b):
    return -(-a // b)


# ---------------------------------------------------------------------------
# Kernels
# ---------------------------------------------------------------------------
def _gemm_bias_kernel(x_ref, w_ref, b_ref, o_ref):
    # out = x @ w_t + b ; w_t is already [K, N] (pre-transposed on the
    # parameter side), so this is the canonical MXU feed with the 128-multiple
    # output dim on the lane axis.
    acc = jax.lax.dot_general(
        x_ref[...], w_ref[...],
        dimension_numbers=(((1,), (0,)), ((), ())),
        preferred_element_type=jnp.float32,
    )
    o_ref[...] = (acc + b_ref[...]).astype(o_ref.dtype)


def _gemm_bias_acc_kernel(x_ref, w_ref, b_ref, o_ref, acc_ref):
    # K-tiled variant: reduction over the feature axis with a VMEM f32
    # accumulator (init at k==0, bias add + writeback at the last k).
    k = pl.program_id(1)

    @pl.when(k == 0)
    def _():
        acc_ref[...] = jnp.zeros_like(acc_ref)

    acc_ref[...] += jax.lax.dot_general(
        x_ref[...], w_ref[...],
        dimension_numbers=(((1,), (0,)), ((), ())),
        preferred_element_type=jnp.float32,
    )

    @pl.when(k == pl.num_programs(1) - 1)
    def _():
        o_ref[...] = (acc_ref[...] + b_ref[...]).astype(o_ref.dtype)


# ---------------------------------------------------------------------------
# Wrapper
# ---------------------------------------------------------------------------
def feat_bottleneck_forward(x, weight, bias, *, type="ori", bn_params=None,
                            tile_m=512, use_bf16_matmul=True,
                            out_dtype=jnp.float32, force_tk=None):
    """Forward pass of feat_bootleneck.

    x:      [batch, feature_dim]
    weight: [bottleneck_dim, feature_dim]   (PyTorch nn.Linear convention)
    bias:   [bottleneck_dim]
    type:   'ori' (module default) -> just the Linear.
            'bn' -> Linear + inference-mode BatchNorm1d folded into (w, b);
                    Dropout(p=0.5) is identity in eval mode.
    use_bf16_matmul: bf16 matmul operands with f32 accumulation (default).
                     Relative error ~2^-8; pass False for full-f32 operands.
    force_tk: testing hook to force a K (feature) tile size (multiple of 128).
    """
    batch, din = x.shape
    dout = weight.shape[0]

    # ---- parameter-side math hoisted out of the kernel --------------------
    w_eff = weight.astype(jnp.float32)
    b_eff = bias.astype(jnp.float32)
    if type == "bn":
        gamma, beta, running_mean, running_var, eps = bn_params
        scale = gamma * jax.lax.rsqrt(running_var + eps)          # [Dout]
        w_eff = w_eff * scale[:, None]
        b_eff = (b_eff - running_mean) * scale + beta
        # Dropout(p=0.5) is identity in eval mode.
        # TODO(synk): training-mode dropout / batch-statistic BN not implemented.

    # Pre-transpose once on the parameter side: kernel sees [K, N].
    w_t = w_eff.T                                                  # [din, dout]

    # Lane-dense output: pad N to a 128 multiple (sliced off at the end).
    dout_pad = _round_up(dout, 128)
    if dout_pad != dout:
        w_t = jnp.pad(w_t, ((0, 0), (0, dout_pad - dout)))
        b_eff = jnp.pad(b_eff, ((0, dout_pad - dout),))
    b_eff = b_eff.reshape(1, dout_pad)

    if use_bf16_matmul:
        x = x.astype(jnp.bfloat16)
        w_t = w_t.astype(jnp.bfloat16)
    else:
        x = x.astype(jnp.float32)
        w_t = w_t.astype(jnp.float32)

    bytes_in = 2 if use_bf16_matmul else 4
    out_bytes = jnp.dtype(out_dtype).itemsize
    granule = 16 if use_bf16_matmul else 8      # bf16 packs two rows / sublane

    # ---- per-generation VMEM budget ---------------------------------------
    try:
        vmem_cap = int(pltpu.get_tpu_info().vmem_capacity_bytes)
    except Exception:
        vmem_cap = 64 * 1024 * 1024             # conservative (v7x-sized) fallback
    budget = (vmem_cap * 3) // 4                # ~96 MiB v5e/v6e, ~48 MiB v7x

    bias_cost = 8 * dout_pad * 4                # sublane-padded, single-buffered

    # ---- resident weight (single-buffered) vs K-tiled fallback ------------
    resident_w = din * dout_pad * bytes_in
    per_row_no_k = 2 * din * bytes_in + 2 * dout_pad * out_bytes   # x + out, 2-deep
    fits_resident = resident_w + bias_cost + granule * per_row_no_k <= budget

    if force_tk is not None:
        assert force_tk % 128 == 0
        k_tiled = force_tk < din
        tk = force_tk
    elif fits_resident:
        k_tiled = False
        tk = din
    else:
        k_tiled = True
        # Keep the two streamed weight buffers under ~half the budget.
        tk = (budget // 2) // (2 * dout_pad * bytes_in)
        tk = max(128, (tk // 128) * 128)
        tk = min(tk, _round_up(din, 128))

    if k_tiled:
        din_pad = _round_up(din, tk)
        if din_pad != din:
            x = jnp.pad(x, ((0, 0), (0, din_pad - din)))
            w_t = jnp.pad(w_t, ((0, din_pad - din), (0, 0)))
        grid_k = din_pad // tk
        fixed = 2 * tk * dout_pad * bytes_in + bias_cost           # 2-deep weight
        per_row = 2 * tk * bytes_in + 2 * dout_pad * out_bytes + dout_pad * 4
    else:
        grid_k = 1
        fixed = resident_w + bias_cost
        per_row = per_row_no_k

    # ---- batch tile: as big as VMEM allows, balanced, >=2 steps if possible
    tm_vmem_max = granule
    if budget > fixed + granule * per_row:
        tm_vmem_max = max(granule, ((budget - fixed) // per_row) // granule * granule)
    tm_cap = max(granule, min(tile_m, tm_vmem_max) // granule * granule)
    min_steps = 2 if batch > granule else 1      # keep both v7x TensorCores busy
    steps = max(_cdiv(batch, tm_cap), min_steps)
    tm = max(granule, min(tm_cap, _round_up(_cdiv(batch, steps), granule)))
    grid_m = _cdiv(batch, tm)
    batch_pad = grid_m * tm
    if batch_pad != batch:
        x = jnp.pad(x, ((0, batch_pad - batch), (0, 0)))

    vmem_limit = int(min(budget, max(32 << 20, fixed + tm * per_row + (4 << 20))))

    # ---- specs / grid ------------------------------------------------------
    if grid_k == 1:
        kernel = _gemm_bias_kernel
        grid = (grid_m,)
        kdim = tk if k_tiled else din
        in_specs = [
            pl.BlockSpec((tm, kdim), lambda i: (i, 0)),                  # x (pipelined)
            pl.BlockSpec((kdim, dout_pad), lambda i: (0, 0),
                         pipeline_mode=pl.Buffered(1)),                  # resident weight
            pl.BlockSpec((1, dout_pad), lambda i: (0, 0),
                         pipeline_mode=pl.Buffered(1)),                  # resident bias
        ]
        out_specs = pl.BlockSpec((tm, dout_pad), lambda i: (i, 0))
        scratch_shapes = []
        dim_sem = ("parallel",)
    else:
        kernel = _gemm_bias_acc_kernel
        grid = (grid_m, grid_k)                                          # reduction last
        in_specs = [
            pl.BlockSpec((tm, tk), lambda i, k: (i, k)),
            pl.BlockSpec((tk, dout_pad), lambda i, k: (k, 0)),
            pl.BlockSpec((1, dout_pad), lambda i, k: (0, 0),
                         pipeline_mode=pl.Buffered(1)),
        ]
        out_specs = pl.BlockSpec((tm, dout_pad), lambda i, k: (i, 0))
        scratch_shapes = [pltpu.VMEM((tm, dout_pad), jnp.float32)]
        dim_sem = ("parallel", "arbitrary")

    out = pl.pallas_call(
        kernel,
        out_shape=jax.ShapeDtypeStruct((batch_pad, dout_pad), out_dtype),
        grid_spec=pltpu.PrefetchScalarGridSpec(
            num_scalar_prefetch=0,
            grid=grid,
            in_specs=in_specs,
            out_specs=out_specs,
            scratch_shapes=scratch_shapes,
        ),
        compiler_params=pltpu.CompilerParams(
            dimension_semantics=dim_sem,
            vmem_limit_bytes=vmem_limit,
        ),
    )(x, w_t, b_eff)

    return out[:batch, :dout]


def init_feat_bottleneck_params(key, feature_dim, bottleneck_dim):
    """Mirror init_weights for nn.Linear: xavier_normal_ weight, zero bias."""
    std = math.sqrt(2.0 / (feature_dim + bottleneck_dim))
    weight = std * jax.random.normal(key, (bottleneck_dim, feature_dim), dtype=jnp.float32)
    bias = jnp.zeros((bottleneck_dim,), dtype=jnp.float32)
    return weight, bias


if __name__ == "__main__":
    key = jax.random.PRNGKey(0)
    k_x, k_w, k_g = jax.random.split(key, 3)

    batch, feature_dim, bottleneck_dim = 8, 256, 64

    x = jax.random.normal(k_x, (batch, feature_dim), dtype=jnp.float32)
    weight, bias = init_feat_bottleneck_params(k_w, feature_dim, bottleneck_dim)

    ref = jnp.dot(x, weight.T, precision=jax.lax.Precision.HIGHEST) + bias

    # 1) type='ori' (module default), f32 operands, resident-weight path.
    out = feat_bottleneck_forward(x, weight, bias, type="ori",
                                  use_bf16_matmul=False)
    out = jax.block_until_ready(out)
    assert out.shape == (batch, bottleneck_dim)
    assert jnp.allclose(out, ref, atol=1e-2, rtol=1e-2)

    # 2) type='ori', forced K-tiled accumulator path (f32).
    out_k = feat_bottleneck_forward(x, weight, bias, type="ori",
                                    use_bf16_matmul=False, force_tk=128)
    out_k = jax.block_until_ready(out_k)
    assert jnp.allclose(out_k, ref, atol=1e-2, rtol=1e-2)

    # 3) type='bn' (inference): BN folded into (w, b), default bf16 operands.
    gamma = 1.0 + 0.02 * jax.random.normal(k_g, (bottleneck_dim,), dtype=jnp.float32)
    beta = jnp.zeros((bottleneck_dim,), dtype=jnp.float32)
    running_mean = jnp.zeros((bottleneck_dim,), dtype=jnp.float32)
    running_var = jnp.ones((bottleneck_dim,), dtype=jnp.float32)
    eps = 1e-5
    out_bn = feat_bottleneck_forward(
        x, weight, bias, type="bn",
        bn_params=(gamma, beta, running_mean, running_var, eps))
    out_bn = jax.block_until_ready(out_bn)
    scale = gamma / jnp.sqrt(running_var + eps)
    ref_bn = (ref - running_mean) * scale + beta
    assert jnp.allclose(out_bn, ref_bn, atol=5e-2, rtol=5e-2)

    print("KERNEL_OK")
</pallas_src>

<mosaic_0001>
module attributes {stable_mosaic.version = 11 : i64} {
  func.func @_gemm_bias_kernel(%arg0: i32, %arg1: memref<8x256xf32, #tpu.memory_space<vmem>>, %arg2: memref<256x128xf32, #tpu.memory_space<vmem>>, %arg3: memref<1x128xf32, #tpu.memory_space<vmem>>, %arg4: memref<8x128xf32, #tpu.memory_space<vmem>>) attributes {dimension_semantics = [#tpu.dimension_semantics<parallel>], iteration_bounds = array<i64: 1>, scalar_prefetch = 0 : i64, scratch_operands = 0 : i64, tpu.core_type = #tpu.core_type<tc>, window_params = [{transform_indices = @transform_0, window_bounds = array<i64: 8, 256>}, {pipeline_mode = #tpu.pipeline_mode<synchronous>, transform_indices = @transform_1, window_bounds = array<i64: 256, 128>}, {pipeline_mode = #tpu.pipeline_mode<synchronous>, transform_indices = @transform_2, window_bounds = array<i64: 1, 128>}, {transform_indices = @transform_3, window_bounds = array<i64: 8, 128>}]} {
    %c0 = arith.constant 0 : index
    %c0_0 = arith.constant 0 : index
    %0 = vector.load %arg1[%c0, %c0_0] : memref<8x256xf32, #tpu.memory_space<vmem>>, vector<8x256xf32>
    %c0_1 = arith.constant 0 : index
    %c0_2 = arith.constant 0 : index
    %1 = vector.load %arg2[%c0_1, %c0_2] : memref<256x128xf32, #tpu.memory_space<vmem>>, vector<256x128xf32>
    %cst = arith.constant dense<0.000000e+00> : vector<8x128xf32>
    %2 = tpu.matmul %0, %1, %cst {dimension_numbers = #tpu.dot_dimension_numbers<[1], [0], [0], [1], [0, 0, 1, 1], [], []>} : vector<8x256xf32>, vector<256x128xf32>, vector<8x128xf32> -> vector<8x128xf32>
    %c0_3 = arith.constant 0 : index
    %c0_4 = arith.constant 0 : index
    %3 = vector.load %arg3[%c0_3, %c0_4] : memref<1x128xf32, #tpu.memory_space<vmem>>, vector<1x128xf32>
    %4 = vector.broadcast %3 : vector<1x128xf32> to vector<8x128xf32>
    %5 = arith.addf %2, %4 : vector<8x128xf32>
    %c0_5 = arith.constant 0 : index
    %c0_6 = arith.constant 0 : index
    %6 = vector.load %arg4[%c0_5, %c0_6] : memref<8x128xf32, #tpu.memory_space<vmem>>, vector<8x128xf32>
    tpu.vector_store %arg4[%c0_5, %c0_6], %5 {strides = array<i32>} : memref<8x128xf32, #tpu.memory_space<vmem>>, vector<8x128xf32>,
    return
  }
  func.func @transform_0(%arg0: i32) -> (i32, i32) {
    %c0_i32 = arith.constant 0 : i32
    %c0_i32_0 = arith.constant 0 : i32
    return %arg0, %c0_i32 : i32, i32
  }
  func.func @transform_1(%arg0: i32) -> (i32, i32) {
    %c0_i32 = arith.constant 0 : i32
    %c0_i32_0 = arith.constant 0 : i32
    %c0_i32_1 = arith.constant 0 : i32
    return %c0_i32, %c0_i32_0 : i32, i32
  }
  func.func @transform_2(%arg0: i32) -> (i32, i32) {
    %c0_i32 = arith.constant 0 : i32
    %c0_i32_0 = arith.constant 0 : i32
    %c0_i32_1 = arith.constant 0 : i32
    return %c0_i32, %c0_i32_0 : i32, i32
  }
  func.func @transform_3(%arg0: i32) -> (i32, i32) {
    %c0_i32 = arith.constant 0 : i32
    %c0_i32_0 = arith.constant 0 : i32
    return %arg0, %c0_i32 : i32, i32
  }
}

</mosaic_0001>

<bundles_post_ra>
// kernel: tpu_custom_call.1
= control target key start
LH: loop header
LB: loop body
LE: loop exit
PB: predicated region body
PF: predicated region fallthrough
CT: control target
= control target key end

     0   :  { %8 = vsyncpa [#allocation3], 0  ;;  %s385_s0 = inlined_call_operand.hbm [shape: f32[8,256], index: 0, kind: input, shape index: {}]   ;;  %s386_s1 = inlined_call_operand.hbm [shape: f32[256,128], index: 1, kind: input, shape index: {}]   ;;  %s387_s2 = inlined_call_operand.vmem [shape: f32[1,128], index: 2, kind: input, shape index: {}]   ;;  %s388_s3 = inlined_call_operand.hbm [shape: f32[8,128], index: 3, kind: output, shape index: {}]  }
   0x1   :  { %9 = vsyncpa [#allocation6], 0 }
   0x2   :  { %10 = vsyncpa [#allocation4], 0  ;;  %s314_s12 = smov [#allocation2]   ;;  %s315_s14 = smov [#allocation5]  }
   0x3   :  { %s17_s13 = sshll.u32 %s314_s12, 4  ;;  %s26_s15 = sshll.u32 %s315_s14, 4  ;;  %s18_s13 = int_to_ptr.vmem [resolvable:$true] %s17_s13  ;;  %s339_s15 = int_to_ptr.vmem [resolvable:$true] %s26_s15 }
   0x4   :  { %s242_s18 = scalar_lea.hbm %s385_s0, 256 }
   0x5   :  { %p243_p0 = scmp.ne.s32.totalorder %s385_s0, %s242_s18  ;;  %p246_p1 = scmp.lt.u32.totalorder %s242_s18, %s385_s0 }
   0x7   :  { %p248_p2 = pnand %p246_p1, %p243_p0 }
   0x9   :  { %251 = shalt.err (!%p248_p2)
}
   0xa   :  { %s252_s23 = scalar_lea.vmem %s18_s13, 256  ;;  %p257_p4 = scmp.lt.s32.totalorder %s18_s13, %s18_s13 }
   0xb   :  { %p253_p3 = scmp.ne.s32.totalorder %s18_s13, %s252_s23  ;;  %p258_p5 = scmp.lt.s32.totalorder %s252_s23, %s252_s23 }
   0xd   :  { %p259_p6 = por %p258_p5, %p257_p4 }
   0xf   :  { %p260_p7 = pnand %p259_p6, %p253_p3 }
  0x11   :  { %263 = shalt.err (!%p260_p7)
}
  0x12   :  { %20 = dma.hbm_to_vmem [thread:$0]  %s385_s0, 256, %s18_s13, [#allocation3]  }
  0x13   :  { %s264_s28 = scalar_lea.hbm %s386_s1, 4096 }
  0x14   :  { %p265_p8 = scmp.ne.s32.totalorder %s386_s1, %s264_s28  ;;  %p268_p9 = scmp.lt.u32.totalorder %s264_s28, %s386_s1 }
  0x16   :  { %p270_p10 = pnand %p268_p9, %p265_p8 }
  0x18   :  { %273 = shalt.err (!%p270_p10)
}
  0x19   :  { %s274_s6 = scalar_lea.vmem %s339_s15, 4096  ;;  %p279_p12 = scmp.lt.s32.totalorder %s339_s15, %s339_s15 }
  0x1a   :  { %p275_p11 = scmp.ne.s32.totalorder %s339_s15, %s274_s6  ;;  %p280_p13 = scmp.lt.s32.totalorder %s274_s6, %s274_s6 }
  0x1c   :  { %p281_p0 = por %p280_p13, %p279_p12 }
  0x1e   :  { %p282_p1 = pnand %p281_p0, %p275_p11 }
  0x20   :  { %285 = shalt.err (!%p282_p1)
}
  0x21   :  { %s316_s0 = smov 128   ;;  %s317_s7 = smov 8  }
  0x22   :  { %32 = dma.hbm_to_vmem [thread:$0]  %s386_s1, 4096, %s339_s15, [#allocation6], %s316_s0, %s316_s0, %s317_s7  }
  0x23   :  { %308 = dma.done.wait [#allocation3], 256  }
  0x24   :  { %309 = vsyncadd [#allocation3], 4294967040 }
  0x25   :  { %310 = dma.done.wait [#allocation6], 4096  }
  0x26   :  { %311 = vsyncadd [#allocation6], 4294963200  ;;  %v59_v0 = vld [vmem:[#allocation5 + $0x80] sm:$0xff]  ;;  %v60_v1 = vld [vmem:[#allocation5 + $0x88] sm:$0xff]  ;;  %s318_s11 = smov [#allocation7]  }
  0x27   :  { %v43_v2 = vld [vmem:[#allocation5] sm:$0xff]  ;;  %v205_v3 = vpack.c.bf16 %v60_v1, %v59_v0  ;;  %v44_v4 = vld [vmem:[#allocation5 + $0x8] sm:$0xff]  ;;  %v61_v5 = vld [vmem:[#allocation5 + $0x90] sm:$0xff]  ;;  %s159_s12 = sshll.u32 %s318_s11, 4  ;;  %s160_s12 = int_to_ptr.vmem [resolvable:$true] %s159_s12 }
  0x28   :  { %v62_v6 = vld [vmem:[#allocation5 + $0x98] sm:$0xff]  ;;  %v207_v7 = vpack.c.bf16 %v44_v4, %v43_v2  ;;  %v45_v9 = vld [vmem:[#allocation5 + $0x10] sm:$0xff]  ;;  %v63_v11 = vld [vmem:[#allocation5 + $0xa0] sm:$0xff]  ;;  %s286_s13 = scalar_lea.vmem %s160_s12, 128  ;;  %p291_p3 = scmp.lt.s32.totalorder %s160_s12, %s160_s12 }
  0x29   :  { %v209_v8 = vpack.c.bf16 %v62_v6, %v61_v5  ;;  %v46_v10 = vld [vmem:[#allocation5 + $0x18] sm:$0xff]  ;;  %206 = vmatprep.subr.bf16.mxu0 %v205_v3  ;;  %v64_v12 = vld [vmem:[#allocation5 + $0xa8] sm:$0xff]  ;;  %v47_v15 = vld [vmem:[#allocation5 + $0x20] sm:$0xff]  ;;  %p287_p2 = scmp.ne.s32.totalorder %s160_s12, %s286_s13  ;;  %p292_p4 = scmp.lt.s32.totalorder %s286_s13, %s286_s13 }
  0x2a   :  { %208 = vmatpush3.bf16.msra.mxu0 %v207_v7  ;;  %v211_v13 = vpack.c.bf16 %v46_v10, %v45_v9  ;;  %v213_v14 = vpack.c.bf16 %v64_v12, %v63_v11  ;;  %v48_v16 = vld [vmem:[#allocation5 + $0x28] sm:$0xff]  ;;  %v65_v17 = vld [vmem:[#allocation5 + $0xb0] sm:$0xff]  ;;  %v66_v18 = vld [vmem:[#allocation5 + $0xb8] sm:$0xff] }
  0x2b   :  { %210 = vmatprep.subr.bf16.mxu0 %v209_v8  ;;  %v215_v19 = vpack.c.bf16 %v48_v16, %v47_v15  ;;  %v217_v20 = vpack.c.bf16 %v66_v18, %v65_v17  ;;  %v49_v21 = vld [vmem:[#allocation5 + $0x30] sm:$0xff]  ;;  %v50_v22 = vld [vmem:[#allocation5 + $0x38] sm:$0xff]  ;;  %v67_v23 = vld [vmem:[#allocation5 + $0xc0] sm:$0xff]  ;;  %p293_p5 = por %p292_p4, %p291_p3 }
  0x2c   :  { %v68_v24 = vld [vmem:[#allocation5 + $0xc8] sm:$0xff]  ;;  %v42_v25 = vld [vmem:[#allocation2 + $0x8] sm:$0xff]  ;;  %v219_v26 = vpack.c.bf16 %v50_v22, %v49_v21  ;;  %v51_v28 = vld [vmem:[#allocation5 + $0x40] sm:$0xff] }
  0x2d   :  { %146 = vmatprep.mubr.f32.mxu0 %v42_v25  ;;  %v221_v27 = vpack.c.bf16 %v68_v24, %v67_v23  ;;  %v52_v29 = vld [vmem:[#allocation5 + $0x48] sm:$0xff]  ;;  %v69_v30 = vld [vmem:[#allocation5 + $0xd0] sm:$0xff]  ;;  %v70_v31 = vld [vmem:[#allocation5 + $0xd8] sm:$0xff]  ;;  %p294_p6 = pnand %p293_p5, %p287_p2 }
  0x2e   :  { %212 = vmatpush3.bf16.msra.mxu0 %v211_v13  ;;  %v223_v32 = vpack.c.bf16 %v52_v29, %v51_v28  ;;  %v225_v33 = vpack.c.bf16 %v70_v31, %v69_v30  ;;  %v53_v34 = vld [vmem:[#allocation5 + $0x50] sm:$0xff]  ;;  %v54_v35 = vld [vmem:[#allocation5 + $0x58] sm:$0xff]  ;;  %v71_v36 = vld [vmem:[#allocation5 + $0xe0] sm:$0xff] }
  0x2f   :  { %214 = vmatprep.subr.bf16.mxu0 %v213_v14  ;;  %v72_v37 = vld [vmem:[#allocation5 + $0xe8] sm:$0xff]  ;;  %v227_v38 = vpack.c.bf16 %v54_v35, %v53_v34  ;;  %v55_v40 = vld [vmem:[#allocation5 + $0x60] sm:$0xff]  ;;  %v73_v42 = vld [vmem:[#allocation5 + $0xf0] sm:$0xff] }
  0x30   :  { %v229_v39 = vpack.c.bf16 %v72_v37, %v71_v36  ;;  %v56_v41 = vld [vmem:[#allocation5 + $0x68] sm:$0xff]  ;;  %v74_v43 = vld [vmem:[#allocation5 + $0xf8] sm:$0xff]  ;;  %v57_v46 = vld [vmem:[#allocation5 + $0x70] sm:$0xff] }
  0x31   :  { %v231_v44 = vpack.c.bf16 %v56_v41, %v55_v40  ;;  %v233_v45 = vpack.c.bf16 %v74_v43, %v73_v42  ;;  %v58_v47 = vld [vmem:[#allocation5 + $0x78] sm:$0xff]  ;;  %v41_v49 = vld [vmem:[#allocation2] sm:$0xff] }
  0x32   :  { %216 = vmatpush3.bf16.msra.mxu0 %v215_v19  ;;  %v235_v48 = vpack.c.bf16 %v58_v47, %v57_v46  ;;  %v169_v51 = vld [vmem:[%s387_s2] ss:$0 sm:$0xff] }
  0x33   :  { %218 = vmatprep.subr.bf16.mxu0 %v217_v20 }
  0x36   :  { %220 = vmatpush3.bf16.msra.mxu0 %v219_v26 }
  0x37   :  { %222 = vmatprep.subr.bf16.mxu0 %v221_v27 }
  0x3a   :  { %224 = vmatpush3.bf16.msra.mxu0 %v223_v32 }
  0x3b   :  { %226 = vmatprep.subr.bf16.mxu0 %v225_v33 }
  0x3e   :  { %228 = vmatpush3.bf16.msra.mxu0 %v227_v38 }
  0x3f   :  { %230 = vmatprep.subr.bf16.mxu0 %v229_v39 }
  0x42   :  { %232 = vmatpush3.bf16.msra.mxu0 %v231_v44 }
  0x43   :  { %234 = vmatprep.subr.bf16.mxu0 %v233_v45 }
  0x46   :  { %236 = vmatpush3.bf16.msra.mxu0 %v235_v48 }
  0x49   :  { %147 = vmatmul.mubr.f32.vlgmr.msra.gmra.mrb[0].mxu0 %v41_v49 }
 0x11c   :  { %v202_v50 = vpop.f32.mrb[0].mxu0 }
 0x11d   :  { %v203_v52 = vpop.f32.mrb[1].mxu0 }
 0x11e   :  { %v204_v53 = vadd.f32 %v203_v52, %v202_v50 }
 0x120   :  { %v149_v54 = vadd.f32 %v204_v53, %v169_v51 }
 0x122   :  { %152 = vst [vmem:[#allocation7] sm:$0xff] %v149_v54 }
 0x123   :  { %297 = shalt.err (!%p294_p6)
}
 0x124   :  { %s298_s16 = scalar_lea.hbm %s388_s3, 128 }
 0x125   :  { %p299_p7 = scmp.ne.s32.totalorder %s388_s3, %s298_s16  ;;  %p302_p8 = scmp.lt.u32.totalorder %s298_s16, %s388_s3 }
 0x127   :  { %p304_p9 = pnand %p302_p8, %p299_p7 }
 0x129   :  { %307 = shalt.err (!%p304_p9)
}
 0x12a   :  { %162 = dma.vmem_to_hbm [thread:$0]  %s160_s12, 128, %s388_s3, [#allocation4]  }
 0x12b   :  { %312 = dma.done.wait [#allocation4], 128  }
 0x12c   :  { %313 = vsyncadd [#allocation4], 4294967168 }
 0x12d   :  { %166 = vsyncpa [#allocation3], 1 }
 0x12e   :  { %167 = vsyncpa [#allocation6], 1 }
 0x12f   :  { %168 = vsyncpa [#allocation4], 1 }

</bundles_post_ra>
